<compile_context>
chip_gen: v6e
topology: v6e:2x2x1
jax: 0.10.0
libtpu: 0.0.40
codegen_flags: <defaults>
</compile_context>

<pallas_src>
import functools

import jax
import jax.numpy as jnp
from jax.experimental import pallas as pl
from jax.experimental.pallas import tpu as pltpu

_IGNORE_INDEX = -100
_VMEM_BUDGET_BYTES = 24 * 1024 * 1024   # footprint target: input block + in-kernel temps
_VMEM_LIMIT_BYTES = 32 * 1024 * 1024    # explicit scoped-VMEM limit (v7x-safe)
_MIN_SPLIT_BYTES = 2 * 1024 * 1024      # only split a single-tile problem if halves stay big


def _round_up(x: int, m: int) -> int:
    return ((x + m - 1) // m) * m


def _pick_tile_n(n: int, c: int, itemsize: int, row_align: int) -> int:
    """Largest row tile whose *total* per-step VMEM footprint fits the budget.

    Per-row footprint (lane dim padded to 128):
      - logits input block, double-buffered .............. 2 * c_pad * itemsize
      - ~4 live (TN, C) f32 temporaries in-kernel ......... 4 * c_pad * 4
      - (TN, 1) targets + nll buffers ((8,128) tile padding
        => 512 B/row), double-buffered .................... 4 * 512
    """
    c_pad = _round_up(c, 128)
    per_row = 2 * c_pad * itemsize + 4 * c_pad * 4 + 4 * 512
    t = max(_VMEM_BUDGET_BYTES // per_row, row_align)
    t = (t // row_align) * row_align
    t = min(t, _round_up(n, row_align))
    # Prefer >= 2 grid steps (pipeline overlap / v7x megacore) when each half still
    # moves a healthy amount of HBM per step.
    half = _round_up((n + 1) // 2, row_align)
    if t >= n and half < t and half * c * itemsize >= _MIN_SPLIT_BYTES:
        t = half
    return int(t)


def _ce_kernel(logits_ref, targets_ref, nll_ref, *, n_valid: int, ignore_index: int):
    i = pl.program_id(0)
    tile_n, c = logits_ref.shape

    x = logits_ref[...]                        # (TN, C) native dtype (f32 / bf16)
    tgt = targets_ref[...]                     # (TN, 1) int32

    # Row max on the native dtype (exact), then a single f32 shift reused for both
    # the exp-sum and the target-logit gather so the upcast copy dies immediately.
    m = jnp.max(x, axis=-1, keepdims=True).astype(jnp.float32)       # (TN, 1)
    shifted = x.astype(jnp.float32) - m                               # (TN, C) f32
    sumexp = jnp.sum(jnp.exp(shifted), axis=-1, keepdims=True)        # (TN, 1)

    # Gather the target logit via a broadcast compare against a (1, C) lane iota
    # (no (TN, C) iota materialization, no dynamic gather on TPU).
    col = jax.lax.broadcasted_iota(jnp.int32, (1, c), 1)              # (1, C)
    tgt_shift = jnp.sum(jnp.where(col == tgt, shifted, 0.0),
                        axis=-1, keepdims=True)                       # (TN, 1)

    # nll = logsumexp(x) - x[tgt] = log(sum exp(x - m)) - (x[tgt] - m)
    nll = jnp.log(sumexp) - tgt_shift                                 # (TN, 1)

    # Mask rows past N (ragged last block: rows not covered by the DMA are stale and
    # may be inf/NaN; the per-row where() keeps them out of the final sum) and
    # ignore_index rows.
    row = jax.lax.broadcasted_iota(jnp.int32, (tile_n, 1), 0) + i * tile_n
    valid = (row < n_valid) & (tgt != ignore_index)
    nll_ref[...] = jnp.where(valid, nll, 0.0)


def cross_entropy_loss(logits: jax.Array, targets: jax.Array, *, tile_n: int | None = None) -> jax.Array:
    """Equivalent of nn.CrossEntropyLoss()(logits, targets) for (N, C) logits."""
    n, c = logits.shape
    targets = targets.astype(jnp.int32)

    itemsize = jnp.dtype(logits.dtype).itemsize
    row_align = 16 if itemsize < 4 else 8
    if tile_n is None:
        tile_n = _pick_tile_n(n, c, itemsize, row_align)

    num_tiles = int(pl.cdiv(n, tile_n))
    padded_n = num_tiles * tile_n

    # Only the tiny int32 targets vector is padded (logits are NOT padded; the ragged
    # last logits block is masked inside the kernel).
    if padded_n != n:
        targets_padded = jnp.pad(targets, ((0, padded_n - n),), constant_values=_IGNORE_INDEX)
    else:
        targets_padded = targets
    targets2d = targets_padded.reshape(padded_n, 1)

    kernel = functools.partial(_ce_kernel, n_valid=n, ignore_index=_IGNORE_INDEX)

    cost = pl.CostEstimate(
        flops=6 * n * c,
        transcendentals=n * c + n,
        bytes_accessed=n * c * itemsize + padded_n * 8,
    )

    nll = pl.pallas_call(
        kernel,
        out_shape=jax.ShapeDtypeStruct((padded_n, 1), jnp.float32),
        grid_spec=pltpu.PrefetchScalarGridSpec(
            num_scalar_prefetch=0,
            grid=(num_tiles,),
            in_specs=[
                pl.BlockSpec((tile_n, c), lambda i: (i, 0)),
                pl.BlockSpec((tile_n, 1), lambda i: (i, 0)),
            ],
            out_specs=pl.BlockSpec((tile_n, 1), lambda i: (i, 0)),
        ),
        compiler_params=pltpu.CompilerParams(
            # TODO(synk): on v7x, verify both TensorCores are active with "parallel";
            # if not, switch this axis to pltpu.CORE_PARALLEL.
            dimension_semantics=("parallel",),
            vmem_limit_bytes=_VMEM_LIMIT_BYTES,
        ),
        cost_estimate=cost,
    )(logits, targets2d)

    # Mean over non-ignored rows (denominator 0 => NaN, matching torch).
    denom = jnp.sum((targets != _IGNORE_INDEX).astype(jnp.float32))
    return jnp.sum(nll) / denom


if __name__ == "__main__":
    key = jax.random.PRNGKey(0)
    k_logits, k_targets = jax.random.split(key)

    # Small shapes consistent with the module: batch of 16 samples, 32 classes.
    N, C = 16, 32
    logits = jax.random.normal(k_logits, (N, C), dtype=jnp.float32)
    targets = jax.random.randint(k_targets, (N,), 0, C, dtype=jnp.int32)

    loss = jax.block_until_ready(cross_entropy_loss(logits, targets))
    logp = jax.nn.log_softmax(logits, axis=-1)
    ref = -jnp.mean(jnp.take_along_axis(logp, targets[:, None], axis=-1))
    assert jnp.allclose(loss, ref, atol=1e-5, rtol=1e-5), (loss, ref)

    # Ragged N (single partial logits block, no padding of logits).
    N2 = 13
    loss2 = jax.block_until_ready(cross_entropy_loss(logits[:N2], targets[:N2]))
    logp2 = jax.nn.log_softmax(logits[:N2], axis=-1)
    ref2 = -jnp.mean(jnp.take_along_axis(logp2, targets[:N2, None], axis=-1))
    assert jnp.allclose(loss2, ref2, atol=1e-5, rtol=1e-5), (loss2, ref2)

    # Multiple grid steps with a ragged last block (forced small tile).
    N3, C3 = 37, 32
    k3a, k3b = jax.random.split(jax.random.PRNGKey(1))
    logits3 = jax.random.normal(k3a, (N3, C3), dtype=jnp.float32)
    targets3 = jax.random.randint(k3b, (N3,), 0, C3, dtype=jnp.int32)
    loss3 = jax.block_until_ready(cross_entropy_loss(logits3, targets3, tile_n=16))
    logp3 = jax.nn.log_softmax(logits3, axis=-1)
    ref3 = -jnp.mean(jnp.take_along_axis(logp3, targets3[:, None], axis=-1))
    assert jnp.allclose(loss3, ref3, atol=1e-5, rtol=1e-5), (loss3, ref3)

    print("KERNEL_OK")
</pallas_src>

<mosaic_0001>
module attributes {stable_mosaic.version = 11 : i64} {
  func.func @_ce_kernel(%arg0: i32, %arg1: memref<16x32xf32, #tpu.memory_space<vmem>>, %arg2: memref<16x1xi32, #tpu.memory_space<vmem>>, %arg3: memref<16x1xf32, #tpu.memory_space<vmem>>) attributes {dimension_semantics = [#tpu.dimension_semantics<parallel>], iteration_bounds = array<i64: 1>, scalar_prefetch = 0 : i64, scratch_operands = 0 : i64, tpu.core_type = #tpu.core_type<tc>, window_params = [{transform_indices = @transform_0, window_bounds = array<i64: 16, 32>}, {transform_indices = @transform_1, window_bounds = array<i64: 16, 1>}, {transform_indices = @transform_2, window_bounds = array<i64: 16, 1>}]} {
    %c0 = arith.constant 0 : index
    %c0_0 = arith.constant 0 : index
    %0 = vector.load %arg1[%c0, %c0_0] : memref<16x32xf32, #tpu.memory_space<vmem>>, vector<16x32xf32>
    %c0_1 = arith.constant 0 : index
    %c0_2 = arith.constant 0 : index
    %1 = vector.load %arg2[%c0_1, %c0_2] : memref<16x1xi32, #tpu.memory_space<vmem>>, vector<16x1xi32>
    %cst = arith.constant dense<0xFF800000> : vector<16xf32>
    %2 = vector.multi_reduction <maximumf>, %0, %cst [1] : vector<16x32xf32> to vector<16xf32>
    %3 = vector.shape_cast %2 : vector<16xf32> to vector<16x1xf32>
    %4 = vector.broadcast %3 : vector<16x1xf32> to vector<16x32xf32>
    %5 = arith.subf %0, %4 : vector<16x32xf32>
    %6 = math.exp %5 : vector<16x32xf32>
    %cst_3 = arith.constant dense<0.000000e+00> : vector<16xf32>
    %7 = vector.multi_reduction <add>, %6, %cst_3 [1] : vector<16x32xf32> to vector<16xf32>
    %8 = vector.shape_cast %7 : vector<16xf32> to vector<16x1xf32>
    %9 = tpu.iota {dimensions = array<i32: 1>} : vector<1x32xi32>
    %10 = vector.broadcast %9 : vector<1x32xi32> to vector<16x32xi32>
    %11 = vector.broadcast %1 : vector<16x1xi32> to vector<16x32xi32>
    %12 = arith.cmpi eq, %10, %11 : vector<16x32xi32>
    %cst_4 = arith.constant 0.000000e+00 : f32
    %13 = vector.broadcast %cst_4 : f32 to vector<16x32xf32>
    %14 = arith.select %12, %5, %13 : vector<16x32xi1>, vector<16x32xf32>
    %cst_5 = arith.constant dense<0.000000e+00> : vector<16xf32>
    %15 = vector.multi_reduction <add>, %14, %cst_5 [1] : vector<16x32xf32> to vector<16xf32>
    %16 = vector.shape_cast %15 : vector<16xf32> to vector<16x1xf32>
    %17 = math.log %8 : vector<16x1xf32>
    %18 = arith.subf %17, %16 : vector<16x1xf32>
    %19 = tpu.iota {dimensions = array<i32: 0>} : vector<16x1xi32>
    %c16_i32 = arith.constant 16 : i32
    %20 = arith.muli %arg0, %c16_i32 : i32
    %21 = vector.broadcast %20 : i32 to vector<16x1xi32>
    %22 = arith.addi %19, %21 : vector<16x1xi32>
    %c16_i32_6 = arith.constant 16 : i32
    %23 = vector.broadcast %c16_i32_6 : i32 to vector<16x1xi32>
    %24 = arith.cmpi slt, %22, %23 : vector<16x1xi32>
    %c-100_i32 = arith.constant -100 : i32
    %25 = vector.broadcast %c-100_i32 : i32 to vector<16x1xi32>
    %26 = arith.cmpi ne, %1, %25 : vector<16x1xi32>
    %27 = arith.andi %24, %26 : vector<16x1xi1>
    %cst_7 = arith.constant 0.000000e+00 : f32
    %28 = vector.broadcast %cst_7 : f32 to vector<16x1xf32>
    %29 = arith.select %27, %18, %28 : vector<16x1xi1>, vector<16x1xf32>
    %c0_8 = arith.constant 0 : index
    %c0_9 = arith.constant 0 : index
    %30 = vector.load %arg3[%c0_8, %c0_9] : memref<16x1xf32, #tpu.memory_space<vmem>>, vector<16x1xf32>
    tpu.vector_store %arg3[%c0_8, %c0_9], %29 {strides = array<i32>} : memref<16x1xf32, #tpu.memory_space<vmem>>, vector<16x1xf32>,
    return
  }
  func.func @transform_0(%arg0: i32) -> (i32, i32) {
    %c0_i32 = arith.constant 0 : i32
    %c0_i32_0 = arith.constant 0 : i32
    return %arg0, %c0_i32 : i32, i32
  }
  func.func @transform_1(%arg0: i32) -> (i32, i32) {
    %c0_i32 = arith.constant 0 : i32
    %c0_i32_0 = arith.constant 0 : i32
    return %arg0, %c0_i32 : i32, i32
  }
  func.func @transform_2(%arg0: i32) -> (i32, i32) {
    %c0_i32 = arith.constant 0 : i32
    %c0_i32_0 = arith.constant 0 : i32
    return %arg0, %c0_i32 : i32, i32
  }
}

</mosaic_0001>

<bundles_post_ra>
// kernel: tpu_custom_call.1
= control target key start
LH: loop header
LB: loop body
LE: loop exit
PB: predicated region body
PF: predicated region fallthrough
CT: control target
= control target key end

     0   :  { %vm15_vm0 = vcmask 261120   ;;  %v91_v2 = vmov 0   ;;  %v34_v13 = vlaneseq  ;;  %vm73_vm4 = vcmask 7168   ;;  %s131_s0 = inlined_call_operand.vmem [shape: f32[16,32], index: 0, kind: input, shape index: {}]   ;;  %s132_s1 = inlined_call_operand.vmem [shape: s32[16,1], index: 1, kind: input, shape index: {}]   ;;  %s133_s2 = inlined_call_operand.vmem [shape: f32[16,1], index: 2, kind: output, shape index: {}]  }
   0x1   :  { %v11_v0 = vld [vmem:[%s131_s0] sm:$0xff]  ;;  %v12_v1 = vld [vmem:[%s131_s0 + $0x8] sm:$0xff]  ;;  %81 = vset.pattern.permute.xlu1 %v91_v2  ;;  %82 = vset.pattern.permute.xlu0 %v91_v2 }
   0x2   :  { %v13_v3 = vld [vmem:[%s132_s1] sm:$0xff]  ;;  %v16_v4 = vsel %vm15_vm0, %v11_v0, -inf  ;;  %v14_v5 = vld [vmem:[%s132_s1 + $0x8] sm:$0xff]  ;;  %v19_v6 = vsel %vm15_vm0, %v12_v1, -inf  ;;  %v35_v15 = vand.u32 127, %v34_v13 }
   0x3   :  { %37 = vperm.xlu1 %81, %v13_v3   ;;  %17 = vmax.xlane.f32.xlu0 %v16_v4  ;;  %vm67_vm3 = vcmp.ne.s32.totalorder %v13_v3, 4294967196  ;;  %vm68_vm5 = vcmp.ne.s32.totalorder %v14_v5, 4294967196 }
   0x7   :  { %40 = vperm.xlu1 %81, %v14_v5   ;;  %20 = vmax.xlane.f32.xlu0 %v19_v6 }
  0x7e   :  { %v38_v14 = vpop.permute.xlu1 %37 }
  0x7f   :  { %vm42_vm1 = vcmp.eq.s32.totalorder %v35_v15, %v38_v14 }
  0x82   :  { %v41_v17 = vpop.permute.xlu1 %40 }
  0x83   :  { %vm43_vm2 = vcmp.eq.s32.totalorder %v35_v15, %v41_v17 }
  0x8c   :  { %v18_v7 = vpop.xlane.xlu0 %17 }
  0x8d   :  { %v22_v8 = vsub.f32 %v11_v0, %v18_v7 }
  0x8f   :  { %v24_v9 = vmul.f32 1.442695, %v22_v8  ;;  %v44_v19 = vsel %vm42_vm1, %v22_v8, 0.0 }
  0x90   :  { %v21_v10 = vpop.xlane.xlu0 %20  ;;  %v46_v21 = vsel %vm15_vm0, %v44_v19, 0.0 }
  0x91   :  { %83 = vpow2.f32 %v24_v9  ;;  %v23_v11 = vsub.f32 %v12_v1, %v21_v10 }
  0x93   :  { %v26_v12 = vmul.f32 1.442695, %v23_v11  ;;  %v45_v23 = vsel %vm43_vm2, %v23_v11, 0.0 }
  0x94   :  { %v49_v24 = vsel %vm15_vm0, %v45_v23, 0.0 }
  0x95   :  { %85 = vpow2.f32 %v26_v12 }
  0x9e   :  { %v84_v16 = vpop.eup %83 }
  0x9f   :  { %v28_v18 = vsel %vm15_vm0, %v84_v16, 0.0 }
  0xa0   :  { %29 = vadd.xlane.f32.xlu0 %v28_v18 }
  0xa2   :  { %v86_v20 = vpop.eup %85 }
  0xa3   :  { %v31_v22 = vsel %vm15_vm0, %v86_v20, 0.0 }
  0xa4   :  { %47 = vadd.xlane.f32.xlu0 %v46_v21  ;;  %32 = vadd.xlane.f32.xlu1 %v31_v22 }
  0xa8   :  { %50 = vadd.xlane.f32.xlu0 %v49_v24 }
 0x129   :  { %v30_v25 = vpop.xlane.xlu0 %29 }
 0x12a   :  { %87 = vlog2.f32 %v30_v25 }
 0x12d   :  { %v33_v26 = vpop.xlane.xlu1 %32  ;;  %v48_v28 = vpop.xlane.xlu0 %47 }
 0x12e   :  { %89 = vlog2.f32 %v33_v26 }
 0x131   :  { %v51_v34 = vpop.xlane.xlu0 %50 }
 0x137   :  { %v88_v27 = vpop.eup %87 }
 0x138   :  { %v53_v29 = vmul.f32 0.6931472, %v88_v27 }
 0x13a   :  { %v56_v30 = vsub.f32 %v53_v29, %v48_v28 }
 0x13b   :  { %v90_v31 = vpop.eup %89 }
 0x13c   :  { %v71_v32 = vsel %vm67_vm3, %v56_v30, 0.0  ;;  %v55_v33 = vmul.f32 0.6931472, %v90_v31 }
 0x13d   :  { %74 = vst.msk [vmem:[%s133_s2] sm:$0xff] %vm73_vm4, %v71_v32 }
 0x13e   :  { %v57_v35 = vsub.f32 %v55_v33, %v51_v34 }
 0x140   :  { %v72_v36 = vsel %vm68_vm5, %v57_v35, 0.0 }
 0x141   :  { %75 = vst.msk [vmem:[%s133_s2 + $0x8] sm:$0xff] %vm73_vm4, %v72_v36 }

</bundles_post_ra>
